<compile_context>
chip_gen: v7x
topology: tpu7x:2x2x1
jax: 0.10.0
libtpu: 0.0.40
codegen_flags: <defaults>
</compile_context>

<pallas_src>
import jax
import jax.numpy as jnp
import numpy as np
from jax.experimental import pallas as pl
from jax.experimental.pallas import tpu as pltpu

NLANE = 128  # lane width of the fused weight slab / z vreg


# ----------------------------- Pallas kernel -------------------------------
def make_mmoe_kernel(E, M, T, out_size, Hpad):
    EM = E * M
    ones_lane = EM            # z[:, ones_lane] == 1.0 by construction (bias carrier)
    gate0 = EM + 1            # first gate-logit lane

    def mmoe_kernel(h_ref, slab_ref, out_ref):
        h = h_ref[...]                                   # (B, Hpad), col H == 1.0
        wf = slab_ref[0:Hpad, :]                         # (Hpad, 128) experts|1|gates
        ws = slab_ref[Hpad:Hpad + NLANE, :]              # (128, 128) collapsed towers

        # MXU pass 1: expert projections + ones lane + gate logits (bias folded).
        z = jnp.dot(h, wf, preferred_element_type=jnp.float32)      # (B, 128)
        eo = jnp.maximum(z, 0.0)                         # relu; ones lane stays 1.0

        # MXU pass 2: per-(task, expert) collapsed tower projection + tower bias
        # (bias enters via the ones-row of ws; rows for gate lanes are zero).
        y = jnp.dot(eo, ws, preferred_element_type=jnp.float32)     # (B, 128)

        outs = []
        for t in range(T):                               # static, tiny T
            if E == 2:
                # packed logit difference (l1 - l0): sigmoid gives gate of expert 1
                d = z[:, gate0 + t:gate0 + t + 1]        # (B, 1)
                g1 = 1.0 / (1.0 + jnp.exp(-d))           # sigmoid, EUP path, no inf
                gate_cols = [1.0 - g1, g1]
            else:
                logits = z[:, gate0 + t * E:gate0 + (t + 1) * E]
                m_ = jnp.max(logits, axis=-1, keepdims=True)
                p = jnp.exp(logits - m_)
                inv = 1.0 / jnp.sum(p, axis=-1, keepdims=True)
                gate_cols = [p[:, e:e + 1] * inv for e in range(E)]

            base = t * E * out_size
            acc = gate_cols[0] * y[:, base:base + out_size]
            for e in range(1, E):                        # static loop
                acc = acc + gate_cols[e] * y[:, base + e * out_size:
                                             base + (e + 1) * out_size]
            outs.append(acc)                             # (B, out_size)

        out_ref[...] = jnp.concatenate(outs, axis=-1)    # (B, T*out_size)

    return mmoe_kernel


def run_mmoe_kernel(hidden_pad, slab, *, E, M, T, out_size):
    B, Hpad = hidden_pad.shape
    vmem = pl.BlockSpec(memory_space=pltpu.MemorySpace.VMEM)
    return pl.pallas_call(
        make_mmoe_kernel(E, M, T, out_size, Hpad),
        out_shape=jax.ShapeDtypeStruct((B, T * out_size), jnp.float32),
        in_specs=[vmem, vmem],
        out_specs=vmem,
    )(hidden_pad, slab)


# ------------------------------ JAX reference -------------------------------
def mmoe_reference(hidden, experts, experts_bias, gates, gates_bias, towers):
    eo = jnp.einsum('ij,jkl->ikl', hidden, experts) + experts_bias
    eo = jax.nn.relu(eo)
    outs = []
    for t in range(len(gates)):
        g = jax.nn.softmax(hidden @ gates[t] + gates_bias[t], axis=-1)
        x = jnp.sum(eo * g[:, None, :], axis=2)
        for (w, b, s, sh) in towers[t]['hidden']:
            x = x @ w + b
            x = x * s + sh
        x = x @ towers[t]['last_w'] + towers[t]['last_b']
        outs.append(x)
    return outs


# ------------------------------ glue packing --------------------------------
def pack_mmoe_params(experts, experts_bias, gates, gates_bias, towers,
                     *, H, E, M, T, out_size):
    """Pack ALL kernel weights into a single (Hpad+128, 128) f32 slab."""
    Hpad = ((H + 1 + 63) // 64) * 64                    # room for the bias lane
    EM = E * M
    ones_lane = EM
    gate0 = EM + 1
    n_gate_lanes = T if E == 2 else T * E
    assert gate0 + n_gate_lanes <= NLANE
    assert T * E * out_size <= NLANE and Hpad <= NLANE

    # ---- fused first-layer weight: [experts | ones | gate logits(/diffs)] ----
    wf = jnp.zeros((Hpad, NLANE), jnp.float32)
    ew = jnp.transpose(experts, (0, 2, 1)).reshape(H, EM)           # expert-major
    wf = wf.at[:H, :EM].set(ew)
    wf = wf.at[H, :EM].set(jnp.transpose(experts_bias, (1, 0)).reshape(EM))
    wf = wf.at[H, ones_lane].set(1.0)                               # constant-1 lane
    if E == 2:
        for t in range(T):
            wf = wf.at[:H, gate0 + t].set(gates[t][:, 1] - gates[t][:, 0])
            wf = wf.at[H, gate0 + t].set(gates_bias[t][1] - gates_bias[t][0])
    else:
        for t in range(T):
            wf = wf.at[:H, gate0 + t * E:gate0 + (t + 1) * E].set(gates[t])
            wf = wf.at[H, gate0 + t * E:gate0 + (t + 1) * E].set(gates_bias[t])

    # ---- collapsed towers stacked per (task, expert), bias on the ones row ----
    ws = jnp.zeros((NLANE, NLANE), jnp.float32)
    for t in range(T):
        Wt = jnp.eye(M, dtype=jnp.float32)
        Bt = jnp.zeros((1, M), jnp.float32)
        for (w, b, s, sh) in towers[t]['hidden']:       # fold eval-BN, then chain
            w_f, b_f = w * s, b * s + sh
            Bt = Bt @ w_f + b_f
            Wt = Wt @ w_f
        Bt = Bt @ towers[t]['last_w'] + towers[t]['last_b']          # (1, out)
        Wt = Wt @ towers[t]['last_w']                                # (M, out)
        for e in range(E):
            c = (t * E + e) * out_size
            ws = ws.at[e * M:(e + 1) * M, c:c + out_size].set(Wt)
            ws = ws.at[ones_lane, c:c + out_size].set(Bt[0])         # sum_e g = 1

    slab = jnp.concatenate([wf, ws], axis=0)            # (Hpad+128, 128)
    return slab, Hpad


def pack_hidden(hidden, Hpad):
    B, H = hidden.shape
    hp = jnp.zeros((B, Hpad), jnp.float32)
    hp = hp.at[:, :H].set(hidden)
    hp = hp.at[:, H].set(1.0)                           # bias lane
    return hp


# --------------------------------- main --------------------------------------
if __name__ == "__main__":
    # config (small, consistent with the module's __init__)
    user_feature_dict = {'user_id': (100, 0), 'user_age': (1, 1)}
    item_feature_dict = {'item_id': (200, 2), 'item_price': (1, 3)}
    emb_dim = 16
    n_expert = 2
    mmoe_hidden_dim = 32
    hidden_dim = [32, 32]
    output_size = 1
    num_task = 2
    batch = 8

    n_cat = sum(1 for v in user_feature_dict.values() if v[0] > 1) + \
            sum(1 for v in item_feature_dict.values() if v[0] > 1)
    n_num = (len(user_feature_dict) + len(item_feature_dict)) - n_cat
    hidden_size = emb_dim * n_cat + n_num               # 16*2 + 2 = 34

    key = jax.random.PRNGKey(0)
    ks = iter(jax.random.split(key, 64))

    # embedding tables (only for categorical features)
    emb_tables = {}
    for name, (n_unique, _) in {**user_feature_dict, **item_feature_dict}.items():
        if n_unique > 1:
            emb_tables[name] = jax.random.normal(next(ks), (n_unique, emb_dim),
                                                 jnp.float32)

    # MMOE core parameters
    experts = jax.random.normal(next(ks), (hidden_size, mmoe_hidden_dim, n_expert),
                                jnp.float32)
    experts_bias = jax.random.uniform(next(ks), (mmoe_hidden_dim, n_expert),
                                      jnp.float32)
    gates = [jax.random.normal(next(ks), (hidden_size, n_expert), jnp.float32)
             for _ in range(num_task)]
    gates_bias = [jax.random.uniform(next(ks), (n_expert,), jnp.float32)
                  for _ in range(num_task)]

    # task towers: Linear + BN(eval) per hidden layer, plus final Linear
    hid_dims = [mmoe_hidden_dim] + hidden_dim
    towers = []
    for _ in range(num_task):
        layers = []
        for j in range(len(hid_dims) - 1):
            w = 0.1 * jax.random.normal(next(ks), (hid_dims[j], hid_dims[j + 1]),
                                        jnp.float32)
            b = 0.1 * jax.random.normal(next(ks), (1, hid_dims[j + 1]), jnp.float32)
            gamma = jax.random.uniform(next(ks), (1, hid_dims[j + 1]), jnp.float32,
                                       0.5, 1.5)
            beta = 0.1 * jax.random.normal(next(ks), (1, hid_dims[j + 1]), jnp.float32)
            rmean = 0.1 * jax.random.normal(next(ks), (1, hid_dims[j + 1]), jnp.float32)
            rvar = jax.random.uniform(next(ks), (1, hid_dims[j + 1]), jnp.float32,
                                      0.5, 1.5)
            scale = gamma / jnp.sqrt(rvar + 1e-5)
            shift = beta - rmean * scale
            layers.append((w, b, scale, shift))
        last_w = 0.1 * jax.random.normal(next(ks), (hid_dims[-1], output_size),
                                         jnp.float32)
        last_b = 0.1 * jax.random.normal(next(ks), (1, output_size), jnp.float32)
        towers.append({'hidden': layers, 'last_w': last_w, 'last_b': last_b})

    # synthetic input x: (batch, num_features); categorical cols hold int ids
    xk1, xk2 = jax.random.split(next(ks))
    x = jnp.zeros((batch, 4), jnp.float32)
    x = x.at[:, 0].set(jax.random.randint(xk1, (batch,), 0, 100).astype(jnp.float32))
    x = x.at[:, 2].set(jax.random.randint(xk2, (batch,), 0, 200).astype(jnp.float32))
    x = x.at[:, 1].set(jax.random.normal(next(ks), (batch,), jnp.float32))
    x = x.at[:, 3].set(jax.random.normal(next(ks), (batch,), jnp.float32))

    # ---------------- glue: embedding lookup + concat (plain JAX) -------------
    cols = []
    for fdict in (user_feature_dict, item_feature_dict):
        for name, (n_unique, idx) in fdict.items():
            if n_unique > 1:
                cols.append(emb_tables[name][x[:, idx].astype(jnp.int32)])
            else:
                cols.append(x[:, idx:idx + 1])
    hidden = jnp.concatenate(cols, axis=1).astype(jnp.float32)     # (B, hidden_size)

    # ---------------- glue: pack/fuse parameters (hoist for serving) ----------
    E, M, T = n_expert, mmoe_hidden_dim, num_task
    slab, Hpad = pack_mmoe_params(experts, experts_bias, gates, gates_bias, towers,
                                  H=hidden_size, E=E, M=M, T=T, out_size=output_size)
    hidden_pad = pack_hidden(hidden, Hpad)                         # (B, Hpad)

    # ---------------- run kernel + verify against pure-JAX reference ----------
    out = jax.block_until_ready(
        run_mmoe_kernel(hidden_pad, slab, E=E, M=M, T=T, out_size=output_size))

    ref = mmoe_reference(hidden, experts, experts_bias, gates, gates_bias, towers)
    for t in range(T):
        np.testing.assert_allclose(
            np.asarray(out[:, t * output_size:(t + 1) * output_size]),
            np.asarray(ref[t]), rtol=1e-3, atol=1e-3)
    print("KERNEL_OK")
</pallas_src>

<mosaic_0001>
module attributes {stable_mosaic.version = 11 : i64} {
  func.func @mmoe_kernel(%arg0: memref<8x64xf32, #tpu.memory_space<vmem>>, %arg1: memref<192x128xf32, #tpu.memory_space<vmem>>, %arg2: memref<8x2xf32, #tpu.memory_space<vmem>>) attributes {dimension_semantics = [], scalar_prefetch = 0 : i64, scratch_operands = 0 : i64, tpu.core_type = #tpu.core_type<tc>} {
    %c0 = arith.constant 0 : index
    %c0_0 = arith.constant 0 : index
    %0 = vector.load %arg0[%c0, %c0_0] : memref<8x64xf32, #tpu.memory_space<vmem>>, vector<8x64xf32>
    %c0_1 = arith.constant 0 : index
    %c0_2 = arith.constant 0 : index
    %1 = vector.load %arg1[%c0_1, %c0_2] : memref<192x128xf32, #tpu.memory_space<vmem>>, vector<64x128xf32>
    %c64 = arith.constant 64 : index
    %c0_3 = arith.constant 0 : index
    %2 = vector.load %arg1[%c64, %c0_3] : memref<192x128xf32, #tpu.memory_space<vmem>>, vector<128x128xf32>
    %cst = arith.constant dense<0.000000e+00> : vector<8x128xf32>
    %3 = tpu.matmul %0, %1, %cst {dimension_numbers = #tpu.dot_dimension_numbers<[1], [0], [0], [1], [0, 0, 1, 1], [], []>} : vector<8x64xf32>, vector<64x128xf32>, vector<8x128xf32> -> vector<8x128xf32>
    %cst_4 = arith.constant 0.000000e+00 : f32
    %4 = vector.broadcast %cst_4 : f32 to vector<8x128xf32>
    %5 = arith.maximumf %3, %4 : vector<8x128xf32>
    %cst_5 = arith.constant dense<0.000000e+00> : vector<8x128xf32>
    %6 = tpu.matmul %5, %2, %cst_5 {dimension_numbers = #tpu.dot_dimension_numbers<[1], [0], [0], [1], [0, 0, 1, 1], [], []>} : vector<8x128xf32>, vector<128x128xf32>, vector<8x128xf32> -> vector<8x128xf32>
    %7 = vector.extract_strided_slice %3 {offsets = [0, 65], sizes = [8, 1], strides = [1, 1]} : vector<8x128xf32> to vector<8x1xf32>
    %cst_6 = arith.constant 0.000000e+00 : f32
    %8 = vector.broadcast %cst_6 : f32 to vector<8x1xf32>
    %9 = arith.subf %8, %7 : vector<8x1xf32>
    %10 = math.exp %9 : vector<8x1xf32>
    %cst_7 = arith.constant 1.000000e+00 : f32
    %11 = vector.broadcast %cst_7 : f32 to vector<8x1xf32>
    %12 = arith.addf %11, %10 : vector<8x1xf32>
    %cst_8 = arith.constant 1.000000e+00 : f32
    %13 = vector.broadcast %cst_8 : f32 to vector<8x1xf32>
    %14 = arith.divf %13, %12 : vector<8x1xf32>
    %cst_9 = arith.constant 1.000000e+00 : f32
    %15 = vector.broadcast %cst_9 : f32 to vector<8x1xf32>
    %16 = arith.subf %15, %14 : vector<8x1xf32>
    %17 = vector.extract_strided_slice %6 {offsets = [0, 0], sizes = [8, 1], strides = [1, 1]} : vector<8x128xf32> to vector<8x1xf32>
    %18 = arith.mulf %16, %17 : vector<8x1xf32>
    %19 = vector.extract_strided_slice %6 {offsets = [0, 1], sizes = [8, 1], strides = [1, 1]} : vector<8x128xf32> to vector<8x1xf32>
    %20 = arith.mulf %14, %19 : vector<8x1xf32>
    %21 = arith.addf %18, %20 : vector<8x1xf32>
    %22 = vector.extract_strided_slice %3 {offsets = [0, 66], sizes = [8, 1], strides = [1, 1]} : vector<8x128xf32> to vector<8x1xf32>
    %cst_10 = arith.constant 0.000000e+00 : f32
    %23 = vector.broadcast %cst_10 : f32 to vector<8x1xf32>
    %24 = arith.subf %23, %22 : vector<8x1xf32>
    %25 = math.exp %24 : vector<8x1xf32>
    %cst_11 = arith.constant 1.000000e+00 : f32
    %26 = vector.broadcast %cst_11 : f32 to vector<8x1xf32>
    %27 = arith.addf %26, %25 : vector<8x1xf32>
    %cst_12 = arith.constant 1.000000e+00 : f32
    %28 = vector.broadcast %cst_12 : f32 to vector<8x1xf32>
    %29 = arith.divf %28, %27 : vector<8x1xf32>
    %cst_13 = arith.constant 1.000000e+00 : f32
    %30 = vector.broadcast %cst_13 : f32 to vector<8x1xf32>
    %31 = arith.subf %30, %29 : vector<8x1xf32>
    %32 = vector.extract_strided_slice %6 {offsets = [0, 2], sizes = [8, 1], strides = [1, 1]} : vector<8x128xf32> to vector<8x1xf32>
    %33 = arith.mulf %31, %32 : vector<8x1xf32>
    %34 = vector.extract_strided_slice %6 {offsets = [0, 3], sizes = [8, 1], strides = [1, 1]} : vector<8x128xf32> to vector<8x1xf32>
    %35 = arith.mulf %29, %34 : vector<8x1xf32>
    %36 = arith.addf %33, %35 : vector<8x1xf32>
    %37 = tpu.concatenate %21, %36 in 1 : vector<8x1xf32>, vector<8x1xf32> -> vector<8x2xf32>
    %c0_14 = arith.constant 0 : index
    %c0_15 = arith.constant 0 : index
    %38 = vector.load %arg2[%c0_14, %c0_15] : memref<8x2xf32, #tpu.memory_space<vmem>>, vector<8x2xf32>
    tpu.vector_store %arg2[%c0_14, %c0_15], %37 {strides = array<i32>} : memref<8x2xf32, #tpu.memory_space<vmem>>, vector<8x2xf32>,
    return
  }
}

</mosaic_0001>

<bundles_post_ra>
// kernel: tpu_custom_call.1
= control target key start
LH: loop header
LB: loop body
LE: loop exit
PB: predicated region body
PF: predicated region fallthrough
CT: control target
= control target key end

     0   :  { %7 = vsyncpa [#allocation3], 0  ;;  %s486_s0 = inlined_call_operand.hbm [shape: f32[8,64], index: 0, kind: input, shape index: {}]   ;;  %s487_s1 = inlined_call_operand.hbm [shape: f32[192,128], index: 1, kind: input, shape index: {}]   ;;  %s488_s2 = inlined_call_operand.vmem [shape: f32[8,2], index: 2, kind: output, shape index: {}]  }
   0x1   :  { %8 = vsyncpa [#allocation5], 0  ;;  %s427_s9 = smov [#allocation2]   ;;  %s428_s11 = smov [#allocation4]  }
   0x2   :  { %s15_s10 = sshll.u32 %s427_s9, 4  ;;  %s24_s12 = sshll.u32 %s428_s11, 4  ;;  %s16_s10 = int_to_ptr.vmem [resolvable:$true] %s15_s10  ;;  %s452_s12 = int_to_ptr.vmem [resolvable:$true] %s24_s12 }
   0x3   :  { %s379_s15 = scalar_lea.hbm %s486_s0, 128 }
   0x4   :  { %p380_p0 = scmp.ne.s32.totalorder %s486_s0, %s379_s15  ;;  %p383_p1 = scmp.lt.u32.totalorder %s379_s15, %s486_s0 }
   0x6   :  { %p385_p2 = pnand %p383_p1, %p380_p0 }
   0x8   :  { %388 = shalt.err (!%p385_p2)
}
   0x9   :  { %s389_s20 = scalar_lea.vmem %s16_s10, 128  ;;  %p394_p4 = scmp.lt.s32.totalorder %s16_s10, %s16_s10 }
   0xa   :  { %p390_p3 = scmp.ne.s32.totalorder %s16_s10, %s389_s20  ;;  %p395_p5 = scmp.lt.s32.totalorder %s389_s20, %s389_s20 }
   0xc   :  { %p396_p6 = por %p395_p5, %p394_p4 }
   0xe   :  { %p397_p7 = pnand %p396_p6, %p390_p3 }
  0x10   :  { %400 = shalt.err (!%p397_p7)
}
  0x11   :  { %18 = dma.hbm_to_vmem [thread:$0]  %s486_s0, 128, %s16_s10, [#allocation3]  }
  0x12   :  { %s401_s25 = scalar_lea.hbm %s487_s1, 3072 }
  0x13   :  { %p402_p8 = scmp.ne.s32.totalorder %s487_s1, %s401_s25  ;;  %p405_p9 = scmp.lt.u32.totalorder %s401_s25, %s487_s1 }
  0x15   :  { %p407_p10 = pnand %p405_p9, %p402_p8 }
  0x17   :  { %410 = shalt.err (!%p407_p10)
}
  0x18   :  { %s411_s30 = scalar_lea.vmem %s452_s12, 3072  ;;  %p416_p12 = scmp.lt.s32.totalorder %s452_s12, %s452_s12 }
  0x19   :  { %p412_p11 = scmp.ne.s32.totalorder %s452_s12, %s411_s30  ;;  %p417_p13 = scmp.lt.s32.totalorder %s411_s30, %s411_s30 }
  0x1b   :  { %p418_p0 = por %p417_p13, %p416_p12 }
  0x1d   :  { %p419_p1 = pnand %p418_p0, %p412_p11 }
  0x1f   :  { %422 = shalt.err (!%p419_p1)
}
  0x20   :  { %s429_s0 = smov 128   ;;  %s430_s3 = smov 8  }
  0x21   :  { %30 = dma.hbm_to_vmem [thread:$0]  %s487_s1, 3072, %s452_s12, [#allocation5], %s429_s0, %s429_s0, %s430_s3  }
  0x22   :  { %423 = dma.done.wait [#allocation3], 128  }
  0x23   :  { %424 = vsyncadd [#allocation3], 4294967168 }
  0x24   :  { %425 = dma.done.wait [#allocation5], 3072  }
  0x25   :  { %426 = vsyncadd [#allocation5], 4294964224  ;;  %v431_v0 = vmov 0.0|0.0   ;;  %vm432_vm0 = vmmov 0   ;;  %v433_v1 = vmov 0.0   ;;  %v38_v2 = vld [vmem:[#allocation4] sm:$0xff] }
  0x26   :  { %329 = vmatprep.subr.bf16.mxu0 %v431_v0  ;;  %291 = vmatprep.mubr.msk.f32.mxu0 %vm432_vm0, %v433_v1  ;;  %v39_v3 = vld [vmem:[#allocation4 + $0x8] sm:$0xff]  ;;  %v40_v4 = vld [vmem:[#allocation4 + $0x10] sm:$0xff]  ;;  %v41_v6 = vld [vmem:[#allocation4 + $0x18] sm:$0xff]  ;;  %vm62_vm1 = vcmask 523264   ;;  %s434_s1 = smov 63   ;;  %s435_s6 = smov 65  }
  0x27   :  { %341 = vmatprep.subr.bf16.mxu1 %v431_v0  ;;  %326 = vmatprep.mubr.msk.f32.mxu1 %vm432_vm0, %v433_v1  ;;  %v330_v5 = vpack.c.bf16 %v39_v3, %v38_v2  ;;  %v333_v7 = vpack.c.bf16 %v41_v6, %v40_v4  ;;  %v46_v8 = vld [vmem:[#allocation4 + $0x40] sm:$0xff]  ;;  %v47_v9 = vld [vmem:[#allocation4 + $0x48] sm:$0xff]  ;;  %v48_v10 = vld [vmem:[#allocation4 + $0x50] sm:$0xff]  ;;  %s436_s7 = smov 64   ;;  %vm238_vm2 = vcmask 7168   ;;  %vm240_vm3 = vcmask 15360  }
  0x28   :  { %v42_v11 = vld [vmem:[#allocation4 + $0x20] sm:$0xff]  ;;  %v43_v12 = vld [vmem:[#allocation4 + $0x28] sm:$0xff]  ;;  %v342_v13 = vpack.c.bf16 %v47_v9, %v46_v8  ;;  %v49_v14 = vld [vmem:[#allocation4 + $0x58] sm:$0xff] }
  0x29   :  { %331 = vmatpush3.bf16.msra.mxu0 %v330_v5  ;;  %v345_v15 = vpack.c.bf16 %v49_v14, %v48_v10  ;;  %v336_v16 = vpack.c.bf16 %v43_v12, %v42_v11  ;;  %v50_v17 = vld [vmem:[#allocation4 + $0x60] sm:$0xff]  ;;  %v51_v18 = vld [vmem:[#allocation4 + $0x68] sm:$0xff]  ;;  %v44_v19 = vld [vmem:[#allocation4 + $0x30] sm:$0xff] }
  0x2a   :  { %332 = vmatprep.subr.bf16.mxu0 %v431_v0  ;;  %343 = vmatpush3.bf16.msra.mxu1 %v342_v13  ;;  %v45_v20 = vld [vmem:[#allocation4 + $0x38] sm:$0xff]  ;;  %v348_v21 = vpack.c.bf16 %v51_v18, %v50_v17  ;;  %v52_v23 = vld [vmem:[#allocation4 + $0x70] sm:$0xff]  ;;  %v54_v27 = vld [vmem:[#allocation4 + $0x80] sm:$0xff] }
  0x2b   :  { %344 = vmatprep.subr.bf16.mxu1 %v431_v0  ;;  %v339_v22 = vpack.c.bf16 %v45_v20, %v44_v19  ;;  %v53_v24 = vld [vmem:[#allocation4 + $0x78] sm:$0xff]  ;;  %v55_v28 = vld [vmem:[#allocation4 + $0x88] sm:$0xff]  ;;  %v56_v30 = vld [vmem:[#allocation4 + $0x90] sm:$0xff] }
  0x2c   :  { %v351_v25 = vpack.c.bf16 %v53_v24, %v52_v23  ;;  %v37_v26 = vld [vmem:[#allocation2] sm:$0xff]  ;;  %v354_v29 = vpack.c.bf16 %v55_v28, %v54_v27  ;;  %v58_v33 = vld [vmem:[#allocation4 + $0xa0] sm:$0xff]  ;;  %v59_v34 = vld [vmem:[#allocation4 + $0xa8] sm:$0xff] }
  0x2d   :  { %334 = vmatpush3.bf16.msra.mxu0 %v333_v7  ;;  %v57_v31 = vld [vmem:[#allocation4 + $0x98] sm:$0xff]  ;;  %v360_v35 = vpack.c.bf16 %v59_v34, %v58_v33  ;;  %v60_v36 = vld [vmem:[#allocation4 + $0xb0] sm:$0xff] }
  0x2e   :  { %335 = vmatprep.subr.bf16.mxu0 %v431_v0  ;;  %346 = vmatpush3.bf16.msra.mxu1 %v345_v15  ;;  %v357_v32 = vpack.c.bf16 %v57_v31, %v56_v30  ;;  %v61_v37 = vld [vmem:[#allocation4 + $0xb8] sm:$0xff] }
  0x2f   :  { %347 = vmatprep.subr.bf16.mxu1 %v431_v0  ;;  %v363_v38 = vpack.c.bf16 %v61_v37, %v60_v36 }
  0x31   :  { %337 = vmatpush3.bf16.msra.mxu0 %v336_v16 }
  0x32   :  { %338 = vmatprep.subr.bf16.mxu0 %v431_v0  ;;  %349 = vmatpush3.bf16.msra.mxu1 %v348_v21 }
  0x33   :  { %350 = vmatprep.subr.bf16.mxu1 %v431_v0 }
  0x35   :  { %340 = vmatpush3.bf16.msra.mxu0 %v339_v22 }
  0x36   :  { %352 = vmatpush3.bf16.msra.mxu1 %v351_v25 }
  0x37   :  { %353 = vmatprep.subr.bf16.mxu1 %v431_v0 }
  0x38   :  { %292 = vmatmul.mubr.msk.f32.vlgmr.msra.gmra.mrb[0].mxu0 %vm62_vm1, %v37_v26 }
  0x3a   :  { %355 = vmatpush3.bf16.msra.mxu1 %v354_v29 }
  0x3b   :  { %356 = vmatprep.subr.bf16.mxu1 %v431_v0 }
  0x3e   :  { %358 = vmatpush3.bf16.msra.mxu1 %v357_v32 }
  0x3f   :  { %359 = vmatprep.subr.bf16.mxu1 %v431_v0 }
  0x42   :  { %361 = vmatpush3.bf16.msra.mxu1 %v360_v35 }
  0x43   :  { %362 = vmatprep.subr.bf16.mxu1 %v431_v0 }
  0x46   :  { %364 = vmatpush3.bf16.msra.mxu1 %v363_v38 }
 0x10b   :  { %v132_v39 = vpop.f32.mrb[0].mxu0 }
 0x10c   :  { %v136_v40 = vmax.f32 %v132_v39, 0.0  ;;  %v293_v41 = vpop.f32.mrb[1].mxu0  ;;  %v207_v44 = vsub.f32 0.0, %v132_v39 }
 0x10e   :  { %327 = vmatmul.mubr.f32.vlgmr.msra.gmra.mrb[0].mxu1 %v136_v40  ;;  %v208_v45 = vmul.f32 1.442695, %v207_v44 }
 0x110   :  { %375 = vpow2.f32 %v208_v45 }
 0x11a   :  { %v376_v46 = vpop.eup %375 }
 0x11b   :  { %v210_v47 = vadd.f32 1.0, %v376_v46 }
 0x11d   :  { %377 = vrcp.f32 %v210_v47 }
 0x127   :  { %v378_v48 = vpop.eup %377 }
 0x128   :  { %v213_v51 = vsub.f32 1.0, %v378_v48 }
 0x1e1   :  { %v203_v42 = vpop.f32.mrb[0].mxu1 }
 0x1e2   :  { %225 = vrot.lane.b32.xlu1 %v203_v42, %s434_s1  ;;  %215 = vrot.lane.b32.xlu0 %v203_v42, %s435_s6  ;;  %v328_v43 = vpop.f32.mrb[1].mxu1 }
 0x1e6   :  { %219 = vrot.lane.b32.xlu0 %v203_v42, %s436_s7 }
 0x254   :  { %v216_v49 = vpop.permute.xlu0 %215  ;;  %v226_v50 = vpop.permute.xlu1 %225 }
 0x255   :  { %v228_v53 = vmul.f32 %v378_v48, %v226_v50  ;;  %v218_v54 = vmul.f32 %v216_v49, %v213_v51 }
 0x258   :  { %v220_v52 = vpop.permute.xlu0 %219 }
 0x259   :  { %v222_v55 = vmul.f32 %v378_v48, %v220_v52  ;;  %v224_v56 = vmul.f32 %v220_v52, %v213_v51 }
 0x25b   :  { %v223_v57 = vadd.f32 %v222_v55, %v218_v54  ;;  %v229_v58 = vadd.f32 %v228_v53, %v224_v56 }
 0x25d   :  { %235 = vrot.lane.b32.xlu0 %v229_v58, %s434_s1  ;;  %231 = vrot.lane.b32.xlu1 %v223_v57, %s434_s1 }
 0x2cf   :  { %v236_v59 = vpop.permute.xlu0 %235  ;;  %v232_v60 = vpop.permute.xlu1 %231 }
 0x2d0   :  { %v239_v61 = vsel %vm238_vm2, %v232_v60, %v236_v59 }
 0x2d1   :  { %241 = vst.msk [vmem:[%s488_s2] sm:$0xff] %vm240_vm3, %v239_v61 }
 0x2d2   :  { %246 = vsyncpa [#allocation3], 1 }
 0x2d3   :  { %247 = vsyncpa [#allocation5], 1 }

</bundles_post_ra>
